<compile_context>
chip_gen: v6e
topology: v6e:2x2x1
jax: 0.10.0
libtpu: 0.0.40
codegen_flags: <defaults>
</compile_context>

<pallas_src>
import functools

import jax
import jax.numpy as jnp
from jax.experimental import pallas as pl
from jax.experimental.pallas import tpu as pltpu


def _smooth_ce_kernel(x_ref, t_ref, loss_ref, *, confidence, smooth_scale):
    """x_ref: (TM, C) logits, t_ref: (TM, 1) int32, loss_ref: (TM, 1) f32."""
    x = x_ref[...].astype(jnp.float32)                 # == x.float()
    t = t_ref[...]                                     # (TM, 1) labels

    # Numerically stable log-sum-exp along the class (lane) axis.
    m = jnp.max(x, axis=-1, keepdims=True)                             # (TM,1)
    lse = jnp.log(jnp.sum(jnp.exp(x - m), axis=-1, keepdims=True))     # (TM,1)

    # Gather x[row, target[row]] via iota-compare (no log_softmax / one-hot
    # materialization):
    #   nll      = (m + lse) - x_t
    #   smooth   = (m + lse) - mean(x)
    #   loss_row = confidence*nll + smoothing*smooth
    #            = (m + lse) - confidence*x_t - (smoothing/C)*sum(x)
    class_ids = jax.lax.broadcasted_iota(jnp.int32, x.shape, 1)
    x_t = jnp.sum(jnp.where(class_ids == t, x, 0.0),
                  axis=-1, keepdims=True)                              # (TM,1)
    x_sum = jnp.sum(x, axis=-1, keepdims=True)                         # (TM,1)

    loss_ref[...] = (m + lse) - confidence * x_t - smooth_scale * x_sum


def _pick_row_tile(n, c, itemsize):
    """Largest sublane-aligned divisor of n with a logits tile <= ~8 MiB."""
    sublane = 8 if itemsize >= 4 else (16 if itemsize == 2 else 32)
    budget = 8 * 1024 * 1024                 # bytes per (single) logits buffer
    tm = min(n, max(sublane, budget // max(1, c * itemsize)))
    tm = (tm // sublane) * sublane
    while tm > sublane and n % tm != 0:
        tm -= sublane
    if tm < sublane or n % tm != 0:
        tm = n                               # full-extent block is always legal
    return tm


def smooth_cross_entropy(x, target, *, smoothing=0.05):
    """Pallas TPU implementation of SmoothCrossEntropy.forward (training)."""
    n, c = x.shape
    confidence = 1.0 - smoothing
    smooth_scale = smoothing / c

    itemsize = jnp.dtype(x.dtype).itemsize
    tm = _pick_row_tile(n, c, itemsize)

    t2 = target.astype(jnp.int32).reshape(n, 1)

    kernel = functools.partial(
        _smooth_ce_kernel, confidence=confidence, smooth_scale=smooth_scale)

    cost = pl.CostEstimate(
        flops=5 * n * c,
        transcendentals=n * c,
        bytes_accessed=n * c * itemsize + n * 4 + n * 4,
    )

    per_row = pl.pallas_call(
        kernel,
        out_shape=jax.ShapeDtypeStruct((n, 1), jnp.float32),
        grid_spec=pltpu.PrefetchScalarGridSpec(
            num_scalar_prefetch=0,
            grid=(n // tm,),
            in_specs=[
                pl.BlockSpec((tm, c), lambda i: (i, 0)),   # logits tile
                pl.BlockSpec((tm, 1), lambda i: (i, 0)),   # labels tile
            ],
            out_specs=pl.BlockSpec((tm, 1), lambda i: (i, 0)),  # per-row loss
        ),
        compiler_params=pltpu.CompilerParams(
            dimension_semantics=("parallel",),   # no cross-step dependency
        ),
        cost_estimate=cost,
    )(x, t2)

    return jnp.mean(per_row)


def _reference(x, target, smoothing=0.05):
    x = x.astype(jnp.float32)
    logprobs = jax.nn.log_softmax(x, axis=-1)
    onehot = jax.nn.one_hot(target, x.shape[1], dtype=jnp.float32)
    nll = -jnp.sum(logprobs * onehot, axis=-1)
    smooth = -jnp.mean(logprobs, axis=-1)
    loss = (1.0 - smoothing) * nll + smoothing * smooth
    return jnp.mean(loss)


if __name__ == "__main__":
    key = jax.random.PRNGKey(0)
    kx, kt = jax.random.split(key)

    N, C = 256, 128  # small: 256 samples, 128 classes
    x = jax.random.normal(kx, (N, C), dtype=jnp.float32)
    target = jax.random.randint(kt, (N,), 0, C, dtype=jnp.int32)

    # f32 path
    loss = jax.block_until_ready(smooth_cross_entropy(x, target, smoothing=0.05))
    ref = _reference(x, target, smoothing=0.05)
    assert jnp.allclose(loss, ref, atol=1e-5, rtol=1e-5), (loss, ref)

    # bf16 path (cast to f32 happens inside the kernel, halves HBM traffic)
    x_bf16 = x.astype(jnp.bfloat16)
    loss_bf16 = jax.block_until_ready(
        smooth_cross_entropy(x_bf16, target, smoothing=0.05))
    ref_bf16 = _reference(x_bf16, target, smoothing=0.05)
    assert jnp.allclose(loss_bf16, ref_bf16, atol=1e-4, rtol=1e-4), (
        loss_bf16, ref_bf16)

    print("KERNEL_OK")
</pallas_src>

<mosaic_0001>
module attributes {stable_mosaic.version = 11 : i64} {
  func.func @_smooth_ce_kernel(%arg0: i32, %arg1: memref<256x128xf32, #tpu.memory_space<vmem>>, %arg2: memref<256x1xi32, #tpu.memory_space<vmem>>, %arg3: memref<256x1xf32, #tpu.memory_space<vmem>>) attributes {dimension_semantics = [#tpu.dimension_semantics<parallel>], iteration_bounds = array<i64: 1>, scalar_prefetch = 0 : i64, scratch_operands = 0 : i64, tpu.core_type = #tpu.core_type<tc>, window_params = [{transform_indices = @transform_0, window_bounds = array<i64: 256, 128>}, {transform_indices = @transform_1, window_bounds = array<i64: 256, 1>}, {transform_indices = @transform_2, window_bounds = array<i64: 256, 1>}]} {
    %c0 = arith.constant 0 : index
    %c0_0 = arith.constant 0 : index
    %0 = vector.load %arg1[%c0, %c0_0] : memref<256x128xf32, #tpu.memory_space<vmem>>, vector<256x128xf32>
    %c0_1 = arith.constant 0 : index
    %c0_2 = arith.constant 0 : index
    %1 = vector.load %arg2[%c0_1, %c0_2] : memref<256x1xi32, #tpu.memory_space<vmem>>, vector<256x1xi32>
    %cst = arith.constant dense<0xFF800000> : vector<256xf32>
    %2 = vector.multi_reduction <maximumf>, %0, %cst [1] : vector<256x128xf32> to vector<256xf32>
    %3 = vector.shape_cast %2 : vector<256xf32> to vector<256x1xf32>
    %4 = vector.broadcast %3 : vector<256x1xf32> to vector<256x128xf32>
    %5 = arith.subf %0, %4 : vector<256x128xf32>
    %6 = math.exp %5 : vector<256x128xf32>
    %cst_3 = arith.constant dense<0.000000e+00> : vector<256xf32>
    %7 = vector.multi_reduction <add>, %6, %cst_3 [1] : vector<256x128xf32> to vector<256xf32>
    %8 = vector.shape_cast %7 : vector<256xf32> to vector<256x1xf32>
    %9 = math.log %8 : vector<256x1xf32>
    %10 = tpu.iota {dimensions = array<i32: 1>} : vector<256x128xi32>
    %11 = vector.broadcast %1 : vector<256x1xi32> to vector<256x128xi32>
    %12 = arith.cmpi eq, %10, %11 : vector<256x128xi32>
    %cst_4 = arith.constant 0.000000e+00 : f32
    %13 = vector.broadcast %cst_4 : f32 to vector<256x128xf32>
    %14 = arith.select %12, %0, %13 : vector<256x128xi1>, vector<256x128xf32>
    %cst_5 = arith.constant dense<0.000000e+00> : vector<256xf32>
    %15 = vector.multi_reduction <add>, %14, %cst_5 [1] : vector<256x128xf32> to vector<256xf32>
    %16 = vector.shape_cast %15 : vector<256xf32> to vector<256x1xf32>
    %cst_6 = arith.constant dense<0.000000e+00> : vector<256xf32>
    %17 = vector.multi_reduction <add>, %0, %cst_6 [1] : vector<256x128xf32> to vector<256xf32>
    %18 = vector.shape_cast %17 : vector<256xf32> to vector<256x1xf32>
    %19 = arith.addf %3, %9 : vector<256x1xf32>
    %cst_7 = arith.constant 0.949999988 : f32
    %20 = vector.broadcast %cst_7 : f32 to vector<256x1xf32>
    %21 = arith.mulf %20, %16 : vector<256x1xf32>
    %22 = arith.subf %19, %21 : vector<256x1xf32>
    %cst_8 = arith.constant 3.906250e-04 : f32
    %23 = vector.broadcast %cst_8 : f32 to vector<256x1xf32>
    %24 = arith.mulf %23, %18 : vector<256x1xf32>
    %25 = arith.subf %22, %24 : vector<256x1xf32>
    %c0_9 = arith.constant 0 : index
    %c0_10 = arith.constant 0 : index
    %26 = vector.load %arg3[%c0_9, %c0_10] : memref<256x1xf32, #tpu.memory_space<vmem>>, vector<256x1xf32>
    tpu.vector_store %arg3[%c0_9, %c0_10], %25 {strides = array<i32>} : memref<256x1xf32, #tpu.memory_space<vmem>>, vector<256x1xf32>,
    return
  }
  func.func @transform_0(%arg0: i32) -> (i32, i32) {
    %c0_i32 = arith.constant 0 : i32
    %c0_i32_0 = arith.constant 0 : i32
    return %arg0, %c0_i32 : i32, i32
  }
  func.func @transform_1(%arg0: i32) -> (i32, i32) {
    %c0_i32 = arith.constant 0 : i32
    %c0_i32_0 = arith.constant 0 : i32
    return %arg0, %c0_i32 : i32, i32
  }
  func.func @transform_2(%arg0: i32) -> (i32, i32) {
    %c0_i32 = arith.constant 0 : i32
    %c0_i32_0 = arith.constant 0 : i32
    return %arg0, %c0_i32 : i32, i32
  }
}

</mosaic_0001>

<bundles_post_ra>
// kernel: tpu_custom_call.1
= control target key start
LH: loop header
LB: loop body
LE: loop exit
PB: predicated region body
PF: predicated region fallthrough
CT: control target
= control target key end

     0   :  { %v981_v32 = vmov 0   ;;  %s1854_s0 = inlined_call_operand.vmem [shape: f32[256,128], index: 0, kind: input, shape index: {}]   ;;  %s1855_s1 = inlined_call_operand.vmem [shape: s32[256,1], index: 1, kind: input, shape index: {}]   ;;  %s1856_s2 = inlined_call_operand.vmem [shape: f32[256,1], index: 2, kind: output, shape index: {}]  }
   0x1   :  { %v1000_v0 = vld [vmem:[%s1854_s0] sm:$0xff]  ;;  %v1005_v1 = vld [vmem:[%s1854_s0 + $0x10] sm:$0xff]  ;;  %v1012_v2 = vld [vmem:[%s1854_s0 + $0x8] sm:$0xff]  ;;  %852 = vset.pattern.permute.xlu1 %v981_v32  ;;  %851 = vset.pattern.permute.xlu0 %v981_v32 }
   0x2   :  { %75 = vmax.xlane.f32.xlu0 %v1000_v0  ;;  %79 = vmax.xlane.f32.xlu1 %v1005_v1  ;;  %v1017_v3 = vld [vmem:[%s1854_s0 + $0x18] sm:$0xff]  ;;  %v1024_v4 = vld [vmem:[%s1854_s0 + $0x20] sm:$0xff]  ;;  %v1029_v5 = vld [vmem:[%s1854_s0 + $0x28] sm:$0xff] }
   0x3   :  { %v1036_v6 = vld [vmem:[%s1854_s0 + $0x30] sm:$0xff]  ;;  %v1041_v7 = vld [vmem:[%s1854_s0 + $0x38] sm:$0xff]  ;;  %v1048_v8 = vld [vmem:[%s1854_s0 + $0x40] sm:$0xff] }
   0x4   :  { %v1053_v9 = vld [vmem:[%s1854_s0 + $0x48] sm:$0xff]  ;;  %v1060_v10 = vld [vmem:[%s1854_s0 + $0x50] sm:$0xff]  ;;  %v1065_v11 = vld [vmem:[%s1854_s0 + $0x58] sm:$0xff] }
   0x5   :  { %v1072_v12 = vld [vmem:[%s1854_s0 + $0x60] sm:$0xff]  ;;  %v1077_v13 = vld [vmem:[%s1854_s0 + $0x68] sm:$0xff]  ;;  %v1084_v14 = vld [vmem:[%s1854_s0 + $0x70] sm:$0xff] }
   0x6   :  { %77 = vmax.xlane.f32.xlu0 %v1012_v2  ;;  %81 = vmax.xlane.f32.xlu1 %v1017_v3  ;;  %v1089_v15 = vld [vmem:[%s1854_s0 + $0x78] sm:$0xff]  ;;  %v1096_v16 = vld [vmem:[%s1854_s0 + $0x80] sm:$0xff]  ;;  %v1101_v17 = vld [vmem:[%s1854_s0 + $0x88] sm:$0xff] }
   0x7   :  { %v1108_v18 = vld [vmem:[%s1854_s0 + $0x90] sm:$0xff]  ;;  %v1113_v19 = vld [vmem:[%s1854_s0 + $0x98] sm:$0xff]  ;;  %v1120_v20 = vld [vmem:[%s1854_s0 + $0xa0] sm:$0xff] }
   0x8   :  { %v1125_v21 = vld [vmem:[%s1854_s0 + $0xa8] sm:$0xff]  ;;  %v1132_v22 = vld [vmem:[%s1854_s0 + $0xb0] sm:$0xff]  ;;  %v1137_v23 = vld [vmem:[%s1854_s0 + $0xb8] sm:$0xff] }
   0x9   :  { %v1144_v24 = vld [vmem:[%s1854_s0 + $0xc0] sm:$0xff]  ;;  %v1149_v25 = vld [vmem:[%s1854_s0 + $0xc8] sm:$0xff]  ;;  %v1156_v26 = vld [vmem:[%s1854_s0 + $0xd0] sm:$0xff] }
   0xa   :  { %83 = vmax.xlane.f32.xlu0 %v1024_v4  ;;  %85 = vmax.xlane.f32.xlu1 %v1029_v5  ;;  %v1161_v27 = vld [vmem:[%s1854_s0 + $0xd8] sm:$0xff]  ;;  %v1168_v28 = vld [vmem:[%s1854_s0 + $0xe0] sm:$0xff]  ;;  %v1173_v29 = vld [vmem:[%s1854_s0 + $0xe8] sm:$0xff] }
   0xb   :  { %v1180_v30 = vld [vmem:[%s1854_s0 + $0xf0] sm:$0xff]  ;;  %v1185_v31 = vld [vmem:[%s1854_s0 + $0xf8] sm:$0xff] }
   0xe   :  { %87 = vmax.xlane.f32.xlu0 %v1036_v6  ;;  %89 = vmax.xlane.f32.xlu1 %v1041_v7 }
  0x12   :  { %91 = vmax.xlane.f32.xlu0 %v1048_v8  ;;  %93 = vmax.xlane.f32.xlu1 %v1053_v9 }
  0x16   :  { %95 = vmax.xlane.f32.xlu0 %v1060_v10  ;;  %97 = vmax.xlane.f32.xlu1 %v1065_v11 }
  0x1a   :  { %99 = vmax.xlane.f32.xlu0 %v1072_v12  ;;  %101 = vmax.xlane.f32.xlu1 %v1077_v13 }
  0x1e   :  { %103 = vmax.xlane.f32.xlu0 %v1084_v14  ;;  %105 = vmax.xlane.f32.xlu1 %v1089_v15 }
  0x22   :  { %107 = vmax.xlane.f32.xlu0 %v1096_v16  ;;  %109 = vmax.xlane.f32.xlu1 %v1101_v17 }
  0x26   :  { %111 = vmax.xlane.f32.xlu0 %v1108_v18  ;;  %113 = vmax.xlane.f32.xlu1 %v1113_v19 }
  0x2a   :  { %115 = vmax.xlane.f32.xlu0 %v1120_v20  ;;  %117 = vmax.xlane.f32.xlu1 %v1125_v21 }
  0x2e   :  { %119 = vmax.xlane.f32.xlu0 %v1132_v22  ;;  %121 = vmax.xlane.f32.xlu1 %v1137_v23 }
  0x32   :  { %123 = vmax.xlane.f32.xlu0 %v1144_v24  ;;  %125 = vmax.xlane.f32.xlu1 %v1149_v25 }
  0x36   :  { %127 = vmax.xlane.f32.xlu0 %v1156_v26  ;;  %129 = vmax.xlane.f32.xlu1 %v1161_v27 }
  0x3a   :  { %131 = vmax.xlane.f32.xlu0 %v1168_v28  ;;  %133 = vmax.xlane.f32.xlu1 %v1173_v29 }
  0x3e   :  { %135 = vmax.xlane.f32.xlu0 %v1180_v30  ;;  %137 = vmax.xlane.f32.xlu1 %v1185_v31 }
  0x8b   :  { %v1189_v33 = vpop.xlane.xlu0 %75  ;;  %v1191_v34 = vpop.xlane.xlu1 %79 }
  0x8c   :  { %v139_v35 = vsub.f32 %v1000_v0, %v1189_v33  ;;  %v141_v36 = vsub.f32 %v1005_v1, %v1191_v34 }
  0x8e   :  { %v171_v37 = vmul.f32 1.442695, %v139_v35  ;;  %v175_v38 = vmul.f32 1.442695, %v141_v36 }
  0x8f   :  { %v1197_v39 = vpop.xlane.xlu0 %77  ;;  %v1199_v40 = vpop.xlane.xlu1 %81 }
  0x90   :  { %853 = vpow2.f32 %v171_v37  ;;  %v140_v41 = vsub.f32 %v1012_v2, %v1197_v39  ;;  %v142_v42 = vsub.f32 %v1017_v3, %v1199_v40 }
  0x91   :  { %855 = vpow2.f32 %v175_v38 }
  0x92   :  { %v173_v43 = vmul.f32 1.442695, %v140_v41  ;;  %v177_v44 = vmul.f32 1.442695, %v142_v42 }
  0x93   :  { %v1205_v45 = vpop.xlane.xlu0 %83  ;;  %v1207_v46 = vpop.xlane.xlu1 %85 }
  0x94   :  { %1885 = vst [vmem:[#allocation2_spill] sm:$0xff] %v1205_v45  ;;  %1886 = vst [vmem:[#allocation3_spill] sm:$0xff] %v1207_v46  ;;  %857 = vpow2.f32 %v173_v43  ;;  %v143_v47 = vsub.f32 %v1024_v4, %v1205_v45  ;;  %v144_v48 = vsub.f32 %v1029_v5, %v1207_v46 }
  0x95   :  { %859 = vpow2.f32 %v177_v44 }
  0x96   :  { %v179_v49 = vmul.f32 1.442695, %v143_v47  ;;  %v181_v50 = vmul.f32 1.442695, %v144_v48 }
  0x97   :  { %v1213_v51 = vpop.xlane.xlu0 %87  ;;  %v1215_v52 = vpop.xlane.xlu1 %89 }
  0x98   :  { %1887 = vst [vmem:[#allocation4_spill] sm:$0xff] %v1213_v51  ;;  %1888 = vst [vmem:[#allocation5_spill] sm:$0xff] %v1215_v52  ;;  %861 = vpow2.f32 %v179_v49  ;;  %v145_v53 = vsub.f32 %v1036_v6, %v1213_v51  ;;  %v146_v54 = vsub.f32 %v1041_v7, %v1215_v52 }
  0x99   :  { %863 = vpow2.f32 %v181_v50 }
  0x9a   :  { %v183_v55 = vmul.f32 1.442695, %v145_v53  ;;  %v185_v56 = vmul.f32 1.442695, %v146_v54 }
  0x9b   :  { %v1221_v57 = vpop.xlane.xlu0 %91  ;;  %v1223_v58 = vpop.xlane.xlu1 %93 }
  0x9c   :  { %1889 = vst [vmem:[#allocation6_spill] sm:$0xff] %v1221_v57  ;;  %1890 = vst [vmem:[#allocation7_spill] sm:$0xff] %v1223_v58  ;;  %865 = vpow2.f32 %v183_v55  ;;  %v147_v59 = vsub.f32 %v1048_v8, %v1221_v57  ;;  %v148_v60 = vsub.f32 %v1053_v9, %v1223_v58 }
  0x9d   :  { %v854_v61 = vpop.eup %853  ;;  %867 = vpow2.f32 %v185_v56 }
  0x9e   :  { %v187_v62 = vmul.f32 1.442695, %v147_v59  ;;  %235 = vadd.xlane.f32.xlu0 %v854_v61  ;;  %v189_v63 = vmul.f32 1.442695, %v148_v60  ;;  %v856_v32 = vpop.eup %855 }
  0x9f   :  { %v1229_v35 = vpop.xlane.xlu0 %95  ;;  %v1231_v36 = vpop.xlane.xlu1 %97 }
  0xa0   :  { %1891 = vst [vmem:[#allocation8_spill] sm:$0xff] %v1229_v35  ;;  %1892 = vst [vmem:[#allocation9_spill] sm:$0xff] %v1231_v36  ;;  %869 = vpow2.f32 %v187_v62  ;;  %v149_v37 = vsub.f32 %v1060_v10, %v1229_v35  ;;  %v150_v38 = vsub.f32 %v1065_v11, %v1231_v36 }
  0xa1   :  { %v858_v41 = vpop.eup %857  ;;  %871 = vpow2.f32 %v189_v63 }
  0xa2   :  { %v191_v42 = vmul.f32 1.442695, %v149_v37  ;;  %239 = vadd.xlane.f32.xlu0 %v856_v32  ;;  %237 = vadd.xlane.f32.xlu1 %v858_v41  ;;  %v193_v43 = vmul.f32 1.442695, %v150_v38  ;;  %v860_v44 = vpop.eup %859 }
  0xa3   :  { %v1237_v47 = vpop.xlane.xlu0 %99  ;;  %v1239_v48 = vpop.xlane.xlu1 %101 }
  0xa4   :  { %1893 = vst [vmem:[#allocation10_spill] sm:$0xff] %v1237_v47  ;;  %1894 = vst [vmem:[#allocation11_spill] sm:$0xff] %v1239_v48  ;;  %873 = vpow2.f32 %v191_v42  ;;  %v151_v49 = vsub.f32 %v1072_v12, %v1237_v47  ;;  %v152_v50 = vsub.f32 %v1077_v13, %v1239_v48 }
  0xa5   :  { %v862_v53 = vpop.eup %861  ;;  %875 = vpow2.f32 %v193_v43 }
  0xa6   :  { %v195_v54 = vmul.f32 1.442695, %v151_v49  ;;  %241 = vadd.xlane.f32.xlu1 %v860_v44  ;;  %243 = vadd.xlane.f32.xlu0 %v862_v53  ;;  %v197_v55 = vmul.f32 1.442695, %v152_v50  ;;  %v864_v56 = vpop.eup %863 }
  0xa7   :  { %v1245_v59 = vpop.xlane.xlu0 %103  ;;  %v1247_v60 = vpop.xlane.xlu1 %105 }
  0xa8   :  { %1895 = vst [vmem:[#allocation12_spill] sm:$0xff] %v1245_v59  ;;  %1896 = vst [vmem:[#allocation13_spill] sm:$0xff] %v1247_v60  ;;  %877 = vpow2.f32 %v195_v54  ;;  %v153_v61 = vsub.f32 %v1084_v14, %v1245_v59  ;;  %v154_v62 = vsub.f32 %v1089_v15, %v1247_v60 }
  0xa9   :  { %v866_v63 = vpop.eup %865  ;;  %879 = vpow2.f32 %v197_v55 }
  0xaa   :  { %v199_v32 = vmul.f32 1.442695, %v153_v61  ;;  %245 = vadd.xlane.f32.xlu1 %v864_v56  ;;  %247 = vadd.xlane.f32.xlu0 %v866_v63  ;;  %v201_v37 = vmul.f32 1.442695, %v154_v62  ;;  %v868_v38 = vpop.eup %867 }
  0xab   :  { %v1253_v41 = vpop.xlane.xlu0 %107  ;;  %v1255_v42 = vpop.xlane.xlu1 %109 }
  0xac   :  { %1897 = vst [vmem:[#allocation14_spill] sm:$0xff] %v1253_v41  ;;  %1898 = vst [vmem:[#allocation15_spill] sm:$0xff] %v1255_v42  ;;  %881 = vpow2.f32 %v199_v32  ;;  %v155_v43 = vsub.f32 %v1096_v16, %v1253_v41  ;;  %v156_v44 = vsub.f32 %v1101_v17, %v1255_v42 }
  0xad   :  { %v870_v49 = vpop.eup %869  ;;  %883 = vpow2.f32 %v201_v37 }
  0xae   :  { %v203_v50 = vmul.f32 1.442695, %v155_v43  ;;  %249 = vadd.xlane.f32.xlu1 %v868_v38  ;;  %251 = vadd.xlane.f32.xlu0 %v870_v49  ;;  %v205_v53 = vmul.f32 1.442695, %v156_v44  ;;  %v872_v54 = vpop.eup %871 }
  0xaf   :  { %v1261_v55 = vpop.xlane.xlu0 %111  ;;  %v1263_v56 = vpop.xlane.xlu1 %113 }
  0xb0   :  { %1899 = vst [vmem:[#allocation16_spill] sm:$0xff] %v1261_v55  ;;  %1900 = vst [vmem:[#allocation17_spill] sm:$0xff] %v1263_v56  ;;  %885 = vpow2.f32 %v203_v50  ;;  %v157_v61 = vsub.f32 %v1108_v18, %v1261_v55  ;;  %v158_v62 = vsub.f32 %v1113_v19, %v1263_v56 }
  0xb1   :  { %v874_v63 = vpop.eup %873  ;;  %887 = vpow2.f32 %v205_v53 }
  0xb2   :  { %v207_v32 = vmul.f32 1.442695, %v157_v61  ;;  %253 = vadd.xlane.f32.xlu1 %v872_v54  ;;  %255 = vadd.xlane.f32.xlu0 %v874_v63  ;;  %v209_v37 = vmul.f32 1.442695, %v158_v62  ;;  %v876_v38 = vpop.eup %875 }
  0xb3   :  { %v1269_v43 = vpop.xlane.xlu0 %115  ;;  %v1271_v44 = vpop.xlane.xlu1 %117 }
  0xb4   :  { %1901 = vst [vmem:[#allocation18_spill] sm:$0xff] %v1269_v43  ;;  %1902 = vst [vmem:[#allocation19_spill] sm:$0xff] %v1271_v44  ;;  %889 = vpow2.f32 %v207_v32  ;;  %v159_v49 = vsub.f32 %v1120_v20, %v1269_v43  ;;  %v160_v50 = vsub.f32 %v1125_v21, %v1271_v44 }
  0xb5   :  { %v878_v55 = vpop.eup %877  ;;  %891 = vpow2.f32 %v209_v37 }
  0xb6   :  { %v211_v56 = vmul.f32 1.442695, %v159_v49  ;;  %257 = vadd.xlane.f32.xlu1 %v876_v38  ;;  %259 = vadd.xlane.f32.xlu0 %v878_v55  ;;  %v213_v53 = vmul.f32 1.442695, %v160_v50  ;;  %v880_v54 = vpop.eup %879 }
  0xb7   :  { %v1277_v61 = vpop.xlane.xlu0 %119  ;;  %v1279_v62 = vpop.xlane.xlu1 %121 }
  0xb8   :  { %1903 = vst [vmem:[#allocation20_spill] sm:$0xff] %v1277_v61  ;;  %1904 = vst [vmem:[#allocation21_spill] sm:$0xff] %v1279_v62  ;;  %893 = vpow2.f32 %v211_v56  ;;  %v161_v63 = vsub.f32 %v1132_v22, %v1277_v61  ;;  %v162_v32 = vsub.f32 %v1137_v23, %v1279_v62 }
  0xb9   :  { %v882_v43 = vpop.eup %881  ;;  %895 = vpow2.f32 %v213_v53 }
  0xba   :  { %v215_v44 = vmul.f32 1.442695, %v161_v63  ;;  %261 = vadd.xlane.f32.xlu1 %v880_v54  ;;  %263 = vadd.xlane.f32.xlu0 %v882_v43  ;;  %v217_v37 = vmul.f32 1.442695, %v162_v32  ;;  %v884_v55 = vpop.eup %883 }
  0xbb   :  { %v1285_v38 = vpop.xlane.xlu0 %123  ;;  %v1287_v49 = vpop.xlane.xlu1 %125 }
  0xbc   :  { %1905 = vst [vmem:[#allocation22_spill] sm:$0xff] %v1285_v38  ;;  %1906 = vst [vmem:[#allocation23_spill] sm:$0xff] %v1287_v49  ;;  %897 = vpow2.f32 %v215_v44  ;;  %v163_v56 = vsub.f32 %v1144_v24, %v1285_v38  ;;  %v164_v50 = vsub.f32 %v1149_v25, %v1287_v49 }
  0xbd   :  { %v886_v61 = vpop.eup %885  ;;  %899 = vpow2.f32 %v217_v37 }
  0xbe   :  { %v219_v62 = vmul.f32 1.442695, %v163_v56  ;;  %265 = vadd.xlane.f32.xlu1 %v884_v55  ;;  %267 = vadd.xlane.f32.xlu0 %v886_v61  ;;  %v221_v53 = vmul.f32 1.442695, %v164_v50  ;;  %v888_v43 = vpop.eup %887 }
  0xbf   :  { %v1293_v54 = vpop.xlane.xlu0 %127  ;;  %v1295_v63 = vpop.xlane.xlu1 %129 }
  0xc0   :  { %1907 = vst [vmem:[#allocation24_spill] sm:$0xff] %v1293_v54  ;;  %1908 = vst [vmem:[#allocation25_spill] sm:$0xff] %v1295_v63  ;;  %901 = vpow2.f32 %v219_v62  ;;  %v165_v44 = vsub.f32 %v1156_v26, %v1293_v54  ;;  %v166_v32 = vsub.f32 %v1161_v27, %v1295_v63 }
  0xc1   :  { %v890_v38 = vpop.eup %889  ;;  %903 = vpow2.f32 %v221_v53 }
  0xc2   :  { %v223_v49 = vmul.f32 1.442695, %v165_v44  ;;  %269 = vadd.xlane.f32.xlu1 %v888_v43  ;;  %271 = vadd.xlane.f32.xlu0 %v890_v38  ;;  %v225_v37 = vmul.f32 1.442695, %v166_v32  ;;  %v892_v61 = vpop.eup %891 }
  0xc3   :  { %v1301_v55 = vpop.xlane.xlu0 %131  ;;  %v1303_v56 = vpop.xlane.xlu1 %133 }
  0xc4   :  { %1909 = vst [vmem:[#allocation26_spill] sm:$0xff] %v1301_v55  ;;  %1910 = vst [vmem:[#allocation27_spill] sm:$0xff] %v1303_v56  ;;  %905 = vpow2.f32 %v223_v49  ;;  %v167_v62 = vsub.f32 %v1168_v28, %v1301_v55  ;;  %v168_v50 = vsub.f32 %v1173_v29, %v1303_v56 }
  0xc5   :  { %v894_v54 = vpop.eup %893  ;;  %907 = vpow2.f32 %v225_v37 }
  0xc6   :  { %v227_v63 = vmul.f32 1.442695, %v167_v62  ;;  %273 = vadd.xlane.f32.xlu1 %v892_v61  ;;  %275 = vadd.xlane.f32.xlu0 %v894_v54  ;;  %v229_v53 = vmul.f32 1.442695, %v168_v50  ;;  %v896_v38 = vpop.eup %895 }
  0xc7   :  { %v1309_v43 = vpop.xlane.xlu0 %135 }
  0xc8   :  { %1911 = vst [vmem:[#allocation28_spill] sm:$0xff] %v1309_v43  ;;  %909 = vpow2.f32 %v227_v63  ;;  %v169_v44 = vsub.f32 %v1180_v30, %v1309_v43 }
  0xc9   :  { %v898_v49 = vpop.eup %897  ;;  %911 = vpow2.f32 %v229_v53  ;;  %v44_v53 = vld [vmem:[%s1855_s1 + $0x8] sm:$0xff] }
  0xca   :  { %v231_v32 = vmul.f32 1.442695, %v169_v44  ;;  %277 = vadd.xlane.f32.xlu1 %v896_v38  ;;  %279 = vadd.xlane.f32.xlu0 %v898_v49  ;;  %v900_v55 = vpop.eup %899  ;;  %v46_v38 = vld [vmem:[%s1855_s1 + $0x18] sm:$0xff]  ;;  %v52_v44 = vld [vmem:[%s1855_s1 + $0x48] sm:$0xff]  ;;  %v47_v49 = vld [vmem:[%s1855_s1 + $0x20] sm:$0xff] }
  0xcc   :  { %913 = vpow2.f32 %v231_v32  ;;  %v54_v32 = vld [vmem:[%s1855_s1 + $0x58] sm:$0xff] }
  0xcd   :  { %v902_v56 = vpop.eup %901 }
  0xce   :  { %281 = vadd.xlane.f32.xlu1 %v900_v55  ;;  %283 = vadd.xlane.f32.xlu0 %v902_v56  ;;  %v904_v37 = vpop.eup %903  ;;  %v45_v55 = vld [vmem:[%s1855_s1 + $0x10] sm:$0xff]  ;;  %v43_v56 = vld [vmem:[%s1855_s1] sm:$0xff] }
  0xd1   :  { %v906_v54 = vpop.eup %905 }
  0xd2   :  { %285 = vadd.xlane.f32.xlu1 %v904_v37  ;;  %287 = vadd.xlane.f32.xlu0 %v906_v54  ;;  %v908_v61 = vpop.eup %907  ;;  %v48_v37 = vld [vmem:[%s1855_s1 + $0x28] sm:$0xff] }
  0xd3   :  { %v56_v54 = vld [vmem:[%s1855_s1 + $0x68] sm:$0xff] }
  0xd5   :  { %v910_v62 = vpop.eup %909 }
  0xd6   :  { %289 = vadd.xlane.f32.xlu1 %v908_v61  ;;  %291 = vadd.xlane.f32.xlu0 %v910_v62  ;;  %v912_v63 = vpop.eup %911  ;;  %v58_v61 = vld [vmem:[%s1855_s1 + $0x78] sm:$0xff]  ;;  %v60_v62 = vld [vmem:[%s1855_s1 + $0x88] sm:$0xff] }
  0xd9   :  { %v914_v50 = vpop.eup %913 }
  0xda   :  { %293 = vadd.xlane.f32.xlu1 %v912_v63  ;;  %295 = vadd.xlane.f32.xlu0 %v914_v50  ;;  %v1346_v63 = vpop.xlane.xlu1 %137  ;;  %v62_v50 = vld [vmem:[%s1855_s1 + $0x98] sm:$0xff] }
  0xdb   :  { %1912 = vst [vmem:[#allocation29_spill] sm:$0xff] %v1346_v63 }
  0xeb   :  { %369 = vperm.xlu1 %852, %v44_v53   ;;  %v170_v53 = vsub.f32 %v1185_v31, %v1346_v63 }
  0xef   :  { %372 = vperm.xlu1 %852, %v45_v55   ;;  %v64_v55 = vld [vmem:[%s1855_s1 + $0xa8] sm:$0xff] }
  0xf0   :  { %366 = vperm.xlu0 %851, %v43_v56   ;;  %v233_v56 = vmul.f32 1.442695, %v170_v53  ;;  %v49_v53 = vld [vmem:[%s1855_s1 + $0x30] sm:$0xff] }
  0xf2   :  { %915 = vpow2.f32 %v233_v56 }
  0xf3   :  { %375 = vperm.xlu1 %852, %v46_v38   ;;  %v66_v38 = vld [vmem:[%s1855_s1 + $0xb8] sm:$0xff] }
  0xf4   :  { %393 = vperm.xlu0 %851, %v52_v44   ;;  %v68_v44 = vld [vmem:[%s1855_s1 + $0xc8] sm:$0xff] }
  0xf7   :  { %378 = vperm.xlu1 %852, %v47_v49   ;;  %v70_v49 = vld [vmem:[%s1855_s1 + $0xd8] sm:$0xff] }
  0xf8   :  { %399 = vperm.xlu0 %851, %v54_v32   ;;  %v72_v32 = vld [vmem:[%s1855_s1 + $0xe8] sm:$0xff] }
  0xfb   :  { %381 = vperm.xlu1 %852, %v48_v37  }
  0xfc   :  { %405 = vperm.xlu0 %851, %v56_v54   ;;  %v74_v54 = vld [vmem:[%s1855_s1 + $0xf8] sm:$0xff] }
  0xff   :  { %v916_v37 = vpop.eup %915 }
 0x100   :  { %411 = vperm.xlu0 %851, %v58_v61  }
 0x104   :  { %417 = vperm.xlu0 %851, %v60_v62  }
 0x108   :  { %423 = vperm.xlu0 %851, %v62_v50  }
 0x10c   :  { %429 = vperm.xlu0 %851, %v64_v55  }
 0x110   :  { %435 = vperm.xlu0 %851, %v66_v38   ;;  %v50_v38 = vld [vmem:[%s1855_s1 + $0x38] sm:$0xff] }
 0x114   :  { %441 = vperm.xlu0 %851, %v68_v44  }
 0x118   :  { %447 = vperm.xlu0 %851, %v70_v49  }
 0x11c   :  { %453 = vperm.xlu0 %851, %v72_v32   ;;  %v51_v32 = vld [vmem:[%s1855_s1 + $0x40] sm:$0xff] }
 0x11f   :  { %297 = vadd.xlane.f32.xlu1 %v916_v37 }
 0x120   :  { %459 = vperm.xlu0 %851, %v74_v54   ;;  %v53_v54 = vld [vmem:[%s1855_s1 + $0x50] sm:$0xff] }
 0x127   :  { %v1371_v61 = vpop.xlane.xlu0 %235 }
 0x12b   :  { %v1373_v62 = vpop.xlane.xlu1 %237  ;;  %v1375_v50 = vpop.xlane.xlu0 %239 }
 0x12c   :  { %917 = vlog2.f32 %v1373_v62 }
 0x12d   :  { %919 = vlog2.f32 %v1371_v61 }
 0x12e   :  { %921 = vlog2.f32 %v1375_v50 }
 0x12f   :  { %v1380_v55 = vpop.xlane.xlu1 %241  ;;  %v1382_v56 = vpop.xlane.xlu0 %243 }
 0x130   :  { %384 = vperm.xlu1 %852, %v49_v53   ;;  %923 = vlog2.f32 %v1380_v55 }
 0x131   :  { %925 = vlog2.f32 %v1382_v56 }
 0x133   :  { %v1387_v44 = vpop.xlane.xlu1 %245  ;;  %v1389_v49 = vpop.xlane.xlu0 %247 }
 0x134   :  { %387 = vperm.xlu1 %852, %v50_v38   ;;  %v55_v38 = vld [vmem:[%s1855_s1 + $0x60] sm:$0xff]  ;;  %927 = vlog2.f32 %v1387_v44 }
 0x135   :  { %929 = vlog2.f32 %v1389_v49 }
 0x137   :  { %v1394_v37 = vpop.xlane.xlu1 %249  ;;  %v1399_v53 = vpop.xlane.xlu0 %251 }
 0x138   :  { %390 = vperm.xlu1 %852, %v51_v32   ;;  %v57_v32 = vld [vmem:[%s1855_s1 + $0x70] sm:$0xff]  ;;  %931 = vlog2.f32 %v1394_v37 }
 0x139   :  { %933 = vlog2.f32 %v1399_v53 }
 0x13b   :  { %v1401_v43 = vpop.xlane.xlu1 %253  ;;  %v1408_v41 = vpop.xlane.xlu0 %255 }
 0x13c   :  { %396 = vperm.xlu1 %852, %v53_v54   ;;  %v59_v54 = vld [vmem:[%s1855_s1 + $0x80] sm:$0xff]  ;;  %935 = vlog2.f32 %v1401_v43 }
 0x13f   :  { %v1406_v63 = vpop.xlane.xlu1 %257  ;;  %v1418_v59 = vpop.xlane.xlu0 %259 }
 0x140   :  { %402 = vperm.xlu1 %852, %v55_v38   ;;  %v61_v38 = vld [vmem:[%s1855_s1 + $0x90] sm:$0xff]  ;;  %937 = vlog2.f32 %v1406_v63 }
 0x141   :  { %939 = vlog2.f32 %v1408_v41 }
 0x142   :  { %941 = vlog2.f32 %v1418_v59 }
 0x143   :  { %v1413_v42 = vpop.xlane.xlu1 %261  ;;  %v1427_v48 = vpop.xlane.xlu0 %263 }
 0x144   :  { %408 = vperm.xlu1 %852, %v57_v32   ;;  %1914 = vst [vmem:[#allocation31_spill] sm:$0xff] %v1427_v48  ;;  %v63_v32 = vld [vmem:[%s1855_s1 + $0xa0] sm:$0xff]  ;;  %943 = vlog2.f32 %v1413_v42 }
 0x147   :  { %v1420_v60 = vpop.xlane.xlu1 %265  ;;  %v1437_v36 = vpop.xlane.xlu0 %267 }
 0x148   :  { %414 = vperm.xlu1 %852, %v59_v54   ;;  %v65_v54 = vld [vmem:[%s1855_s1 + $0xb0] sm:$0xff]  ;;  %1916 = vst [vmem:[#allocation33_spill] sm:$0xff] %v1437_v36  ;;  %945 = vlog2.f32 %v1420_v60 }
 0x14b   :  { %v1425_v47 = vpop.xlane.xlu1 %269  ;;  %v1446_v52 = vpop.xlane.xlu0 %271 }
 0x14c   :  { %1913 = vst [vmem:[#allocation30_spill] sm:$0xff] %v1425_v47  ;;  %420 = vperm.xlu1 %852, %v61_v38   ;;  %v67_v38 = vld [vmem:[%s1855_s1 + $0xc0] sm:$0xff]  ;;  %1919 = vst [vmem:[#allocation36_spill] sm:$0xff] %v1446_v52 }
 0x14f   :  { %v1432_v35 = vpop.xlane.xlu1 %273 }
 0x150   :  { %1915 = vst [vmem:[#allocation32_spill] sm:$0xff] %v1432_v35  ;;  %426 = vperm.xlu1 %852, %v63_v32   ;;  %v69_v32 = vld [vmem:[%s1855_s1 + $0xd0] sm:$0xff] }
 0x153   :  { %v1439_v57 = vpop.xlane.xlu1 %277 }
 0x154   :  { %1917 = vst [vmem:[#allocation34_spill] sm:$0xff] %v1439_v57  ;;  %432 = vperm.xlu1 %852, %v65_v54   ;;  %v71_v54 = vld [vmem:[%s1855_s1 + $0xe0] sm:$0xff]  ;;  %v1456_v57 = vpop.xlane.xlu0 %275 }
 0x155   :  { %1921 = vst [vmem:[#allocation38_spill] sm:$0xff] %v1456_v57 }
 0x157   :  { %v1444_v58 = vpop.xlane.xlu1 %281 }
 0x158   :  { %1918 = vst [vmem:[#allocation35_spill] sm:$0xff] %v1444_v58  ;;  %438 = vperm.xlu1 %852, %v67_v38   ;;  %v363_v58 = vlaneseq  ;;  %v73_v38 = vld [vmem:[%s1855_s1 + $0xf0] sm:$0xff] }
 0x15a   :  { %v1465_v47 = vand.u32 127, %v363_v58 }
 0x15b   :  { %v1451_v35 = vpop.xlane.xlu1 %285 }
 0x15c   :  { %1920 = vst [vmem:[#allocation37_spill] sm:$0xff] %v1451_v35  ;;  %444 = vperm.xlu1 %852, %v69_v32   ;;  %v1467_v32 = vpop.xlane.xlu0 %279 }
 0x15d   :  { %1924 = vst [vmem:[#allocation41_spill] sm:$0xff] %v1467_v32 }
 0x15f   :  { %v1458_v51 = vpop.xlane.xlu1 %289 }
 0x160   :  { %1922 = vst [vmem:[#allocation39_spill] sm:$0xff] %v1458_v51  ;;  %450 = vperm.xlu1 %852, %v71_v54   ;;  %v1471_v51 = vpop.xlane.xlu0 %283 }
 0x161   :  { %1925 = vst [vmem:[#allocation42_spill] sm:$0xff] %v1471_v51 }
 0x163   :  { %v1463_v52 = vpop.xlane.xlu1 %293 }
 0x164   :  { %1923 = vst [vmem:[#allocation40_spill] sm:$0xff] %v1463_v52  ;;  %456 = vperm.xlu1 %852, %v73_v38   ;;  %v1475_v38 = vpop.xlane.xlu0 %287 }
 0x165   :  { %1926 = vst [vmem:[#allocation43_spill] sm:$0xff] %v1475_v38 }
 0x167   :  { %v370_v35 = vpop.permute.xlu1 %369 }
 0x168   :  { %vm462_vm0 = vcmp.eq.s32.totalorder %v1465_v47, %v370_v35  ;;  %v1479_v35 = vpop.xlane.xlu0 %291 }
 0x169   :  { %v494_v57 = vsel %vm462_vm0, %v1012_v2, 0.0  ;;  %1927 = vst [vmem:[#allocation44_spill] sm:$0xff] %v1479_v35 }
 0x16a   :  { %527 = vadd.xlane.f32.xlu0 %v494_v57 }
 0x16b   :  { %v373_v54 = vpop.permute.xlu1 %372 }
 0x16c   :  { %vm463_vm1 = vcmp.eq.s32.totalorder %v1465_v47, %v373_v54  ;;  %v1481_v57 = vpop.xlane.xlu0 %295 }
 0x16d   :  { %v495_v36 = vsel %vm463_vm1, %v1005_v1, 0.0  ;;  %1928 = vst [vmem:[#allocation45_spill] sm:$0xff] %v1481_v57 }
 0x16e   :  { %529 = vadd.xlane.f32.xlu0 %v495_v36 }
 0x16f   :  { %v376_v52 = vpop.permute.xlu1 %375 }
 0x170   :  { %v367_v51 = vpop.permute.xlu0 %366  ;;  %vm464_vm4 = vcmp.eq.s32.totalorder %v1465_v47, %v376_v52 }
 0x171   :  { %vm461_vm3 = vcmp.eq.s32.totalorder %v1465_v47, %v367_v51  ;;  %v496_v38 = vsel %vm464_vm4, %v1017_v3, 0.0 }
 0x172   :  { %v493_v54 = vsel %vm461_vm3, %v1000_v0, 0.0 }
 0x173   :  { %v379_v58 = vpop.permute.xlu1 %378 }
 0x174   :  { %vm465_vm2 = vcmp.eq.s32.totalorder %v1465_v47, %v379_v58  ;;  %v394_v58 = vpop.permute.xlu0 %393 }
 0x175   :  { %v497_v32 = vsel %vm465_vm2, %v1024_v4, 0.0  ;;  %vm470_vm8 = vcmp.eq.s32.totalorder %v1465_v47, %v394_v58 }
 0x176   :  { %533 = vadd.xlane.f32.xlu0 %v497_v32 }
 0x177   :  { %v382_v36 = vpop.permute.xlu1 %381 }
 0x178   :  { %vm466_vm5 = vcmp.eq.s32.totalorder %v1465_v47, %v382_v36  ;;  %v400_v35 = vpop.permute.xlu0 %399 }
 0x179   :  { %v498_v32 = vsel %vm466_vm5, %v1029_v5, 0.0  ;;  %vm472_vm10 = vcmp.eq.s32.totalorder %v1465_v47, %v400_v35 }
 0x17c   :  { %v406_v57 = vpop.permute.xlu0 %405 }
 0x17d   :  { %vm474_vm12 = vcmp.eq.s32.totalorder %v1465_v47, %v406_v57 }
 0x180   :  { %v412_v51 = vpop.permute.xlu0 %411 }
 0x181   :  { %vm476_vm14 = vcmp.eq.s32.totalorder %v1465_v47, %v412_v51 }
 0x184   :  { %v418_v36 = vpop.permute.xlu0 %417 }
 0x185   :  { %vm478_vm0 = vcmp.eq.s32.totalorder %v1465_v47, %v418_v36 }
 0x188   :  { %525 = vadd.xlane.f32.xlu1 %v493_v54 }
 0x18c   :  { %531 = vadd.xlane.f32.xlu1 %v496_v38 }
 0x190   :  { %535 = vadd.xlane.f32.xlu1 %v498_v32 }
 0x1a8   :  { %v1489_v48 = vpop.xlane.xlu1 %297 }
 0x1a9   :  { %1929 = vst [vmem:[#allocation46_spill] sm:$0xff] %v1489_v48  ;;  %v502_v48 = vsel %vm470_vm8, %v1053_v9, 0.0 }
 0x1ac   :  { %v385_v46 = vpop.permute.xlu1 %384 }
 0x1ad   :  { %vm467_vm6 = vcmp.eq.s32.totalorder %v1465_v47, %v385_v46  ;;  %v424_v46 = vpop.permute.xlu0 %423 }
 0x1ae   :  { %v499_v52 = vsel %vm467_vm6, %v1036_v6, 0.0  ;;  %vm480_vm2 = vcmp.eq.s32.totalorder %v1465_v47, %v424_v46 }
 0x1af   :  { %537 = vadd.xlane.f32.xlu0 %v499_v52 }
 0x1b0   :  { %v388_v54 = vpop.permute.xlu1 %387 }
 0x1b1   :  { %vm468_vm7 = vcmp.eq.s32.totalorder %v1465_v47, %v388_v54  ;;  %v504_v54 = vsel %vm472_vm10, %v1065_v11, 0.0  ;;  %v430_v35 = vpop.permute.xlu0 %429 }
 0x1b2   :  { %v500_v38 = vsel %vm468_vm7, %v1041_v7, 0.0  ;;  %vm482_vm4 = vcmp.eq.s32.totalorder %v1465_v47, %v430_v35 }
 0x1b3   :  { %539 = vadd.xlane.f32.xlu1 %v500_v38 }
 0x1b4   :  { %v391_v32 = vpop.permute.xlu1 %390 }
 0x1b5   :  { %vm469_vm9 = vcmp.eq.s32.totalorder %v1465_v47, %v391_v32  ;;  %v506_v32 = vsel %vm474_vm12, %v1077_v13, 0.0 }
 0x1b6   :  { %v501_v45 = vsel %vm469_vm9, %v1048_v8, 0.0 }
 0x1b7   :  { %541 = vadd.xlane.f32.xlu0 %v501_v45  ;;  %543 = vadd.xlane.f32.xlu1 %v502_v48 }
 0x1b8   :  { %v397_v52 = vpop.permute.xlu1 %396 }
 0x1b9   :  { %vm471_vm11 = vcmp.eq.s32.totalorder %v1465_v47, %v397_v52  ;;  %v508_v52 = vsel %vm476_vm14, %v1089_v15, 0.0 }
 0x1ba   :  { %v503_v58 = vsel %vm471_vm11, %v1060_v10, 0.0 }
 0x1bb   :  { %545 = vadd.xlane.f32.xlu0 %v503_v58  ;;  %547 = vadd.xlane.f32.xlu1 %v504_v54  ;;  %v436_v54 = vpop.permute.xlu0 %435 }
 0x1bc   :  { %v403_v38 = vpop.permute.xlu1 %402  ;;  %vm484_vm6 = vcmp.eq.s32.totalorder %v1465_v47, %v436_v54 }
 0x1bd   :  { %vm473_vm13 = vcmp.eq.s32.totalorder %v1465_v47, %v403_v38  ;;  %v510_v38 = vsel %vm478_vm0, %v1101_v17, 0.0  ;;  %vm813_vm0 = vcmask 7168  }
 0x1be   :  { %v505_v45 = vsel %vm473_vm13, %v1072_v12, 0.0 }
 0x1bf   :  { %549 = vadd.xlane.f32.xlu0 %v505_v45  ;;  %551 = vadd.xlane.f32.xlu1 %v506_v32  ;;  %v512_v45 = vsel %vm480_vm2, %v1113_v19, 0.0  ;;  %v442_v36 = vpop.permute.xlu0 %441 }
 0x1c0   :  { %v409_v48 = vpop.permute.xlu1 %408  ;;  %vm486_vm8 = vcmp.eq.s32.totalorder %v1465_v47, %v442_v36 }
 0x1c1   :  { %vm475_vm15 = vcmp.eq.s32.totalorder %v1465_v47, %v409_v48 }
 0x1c2   :  { %v507_v57 = vsel %vm475_vm15, %v1084_v14, 0.0 }
 0x1c3   :  { %553 = vadd.xlane.f32.xlu0 %v507_v57  ;;  %555 = vadd.xlane.f32.xlu1 %v508_v52  ;;  %v514_v57 = vsel %vm482_vm4, %v1125_v21, 0.0 }
 0x1c4   :  { %v415_v58 = vpop.permute.xlu1 %414 }
 0x1c5   :  { %vm477_vm1 = vcmp.eq.s32.totalorder %v1465_v47, %v415_v58  ;;  %v448_v58 = vpop.permute.xlu0 %447 }
 0x1c6   :  { %v509_v51 = vsel %vm477_vm1, %v1096_v16, 0.0  ;;  %vm488_vm10 = vcmp.eq.s32.totalorder %v1465_v47, %v448_v58 }
 0x1c7   :  { %557 = vadd.xlane.f32.xlu0 %v509_v51  ;;  %559 = vadd.xlane.f32.xlu1 %v510_v38  ;;  %v516_v51 = vsel %vm484_vm6, %v1137_v23, 0.0 }
 0x1c8   :  { %v421_v32 = vpop.permute.xlu1 %420 }
 0x1c9   :  { %vm479_vm3 = vcmp.eq.s32.totalorder %v1465_v47, %v421_v32  ;;  %v454_v54 = vpop.permute.xlu0 %453 }
 0x1ca   :  { %v511_v48 = vsel %vm479_vm3, %v1108_v18, 0.0  ;;  %vm490_vm12 = vcmp.eq.s32.totalorder %v1465_v47, %v454_v54 }
 0x1cb   :  { %561 = vadd.xlane.f32.xlu0 %v511_v48  ;;  %563 = vadd.xlane.f32.xlu1 %v512_v45  ;;  %v518_v45 = vsel %vm486_vm8, %v1149_v25, 0.0 }
 0x1cc   :  { %v427_v52 = vpop.permute.xlu1 %426 }
 0x1cd   :  { %vm481_vm5 = vcmp.eq.s32.totalorder %v1465_v47, %v427_v52 }
 0x1ce   :  { %v513_v46 = vsel %vm481_vm5, %v1120_v20, 0.0 }
 0x1cf   :  { %565 = vadd.xlane.f32.xlu0 %v513_v46  ;;  %567 = vadd.xlane.f32.xlu1 %v514_v57  ;;  %v520_v57 = vsel %vm488_vm10, %v1161_v27, 0.0  ;;  %v460_v46 = vpop.permute.xlu0 %459 }
 0x1d0   :  { %v433_v38 = vpop.permute.xlu1 %432  ;;  %vm492_vm14 = vcmp.eq.s32.totalorder %v1465_v47, %v460_v46 }
 0x1d1   :  { %vm483_vm7 = vcmp.eq.s32.totalorder %v1465_v47, %v433_v38 }
 0x1d2   :  { %v515_v35 = vsel %vm483_vm7, %v1132_v22, 0.0 }
 0x1d3   :  { %569 = vadd.xlane.f32.xlu0 %v515_v35  ;;  %571 = vadd.xlane.f32.xlu1 %v516_v51  ;;  %v522_v51 = vsel %vm490_vm12, %v1173_v29, 0.0 }
 0x1d4   :  { %v439_v32 = vpop.permute.xlu1 %438 }
 0x1d5   :  { %vm485_vm9 = vcmp.eq.s32.totalorder %v1465_v47, %v439_v32  ;;  %v524_v32 = vsel %vm492_vm14, %v1185_v31, 0.0 }
 0x1d6   :  { %v517_v48 = vsel %vm485_vm9, %v1144_v24, 0.0 }
 0x1d7   :  { %573 = vadd.xlane.f32.xlu0 %v517_v48  ;;  %575 = vadd.xlane.f32.xlu1 %v518_v45 }
 0x1d8   :  { %v445_v52 = vpop.permute.xlu1 %444 }
 0x1d9   :  { %vm487_vm11 = vcmp.eq.s32.totalorder %v1465_v47, %v445_v52 }
 0x1da   :  { %v519_v36 = vsel %vm487_vm11, %v1156_v26, 0.0 }
 0x1db   :  { %577 = vadd.xlane.f32.xlu0 %v519_v36  ;;  %579 = vadd.xlane.f32.xlu1 %v520_v57 }
 0x1dc   :  { %v451_v38 = vpop.permute.xlu1 %450 }
 0x1dd   :  { %vm489_vm13 = vcmp.eq.s32.totalorder %v1465_v47, %v451_v38 }
 0x1de   :  { %v521_v58 = vsel %vm489_vm13, %v1168_v28, 0.0 }
 0x1df   :  { %581 = vadd.xlane.f32.xlu0 %v521_v58  ;;  %583 = vadd.xlane.f32.xlu1 %v522_v51 }
 0x1e0   :  { %v457_v35 = vpop.permute.xlu1 %456 }
 0x1e1   :  { %vm491_vm15 = vcmp.eq.s32.totalorder %v1465_v47, %v457_v35 }
 0x1e2   :  { %v523_v45 = vsel %vm491_vm15, %v1180_v30, 0.0 }
 0x1e3   :  { %585 = vadd.xlane.f32.xlu0 %v523_v45  ;;  %587 = vadd.xlane.f32.xlu1 %v524_v32 }
 0x1e7   :  { %589 = vadd.xlane.f32.xlu0 %v1000_v0  ;;  %591 = vadd.xlane.f32.xlu1 %v1012_v2 }
 0x1eb   :  { %593 = vadd.xlane.f32.xlu0 %v1005_v1  ;;  %595 = vadd.xlane.f32.xlu1 %v1017_v3 }
 0x1ef   :  { %597 = vadd.xlane.f32.xlu0 %v1024_v4  ;;  %599 = vadd.xlane.f32.xlu1 %v1029_v5 }
 0x1f3   :  { %601 = vadd.xlane.f32.xlu0 %v1036_v6  ;;  %603 = vadd.xlane.f32.xlu1 %v1041_v7  ;;  %v528_v1 = vpop.xlane.xlu0 %527 }
 0x1f4   :  { %v686_v56 = vmul.f32 0.95, %v528_v1 }
 0x1f7   :  { %605 = vadd.xlane.f32.xlu0 %v1048_v8  ;;  %607 = vadd.xlane.f32.xlu1 %v1053_v9  ;;  %v530_v3 = vpop.xlane.xlu0 %529 }
 0x1f8   :  { %v687_v46 = vmul.f32 0.95, %v530_v3 }
 0x1fb   :  { %609 = vadd.xlane.f32.xlu0 %v1060_v10  ;;  %611 = vadd.xlane.f32.xlu1 %v1065_v11 }
 0x1ff   :  { %613 = vadd.xlane.f32.xlu0 %v1072_v12  ;;  %615 = vadd.xlane.f32.xlu1 %v1077_v13  ;;  %v1577_v4 = vpop.xlane.xlu0 %533 }
 0x200   :  { %v689_v3 = vmul.f32 0.95, %v1577_v4  ;;  %v1930_v4 = vld [vmem:[#allocation2_spill] sm:$0xff] }
 0x203   :  { %617 = vadd.xlane.f32.xlu0 %v1084_v14  ;;  %619 = vadd.xlane.f32.xlu1 %v1089_v15 }
 0x207   :  { %621 = vadd.xlane.f32.xlu0 %v1096_v16  ;;  %623 = vadd.xlane.f32.xlu1 %v1101_v17 }
 0x20b   :  { %625 = vadd.xlane.f32.xlu0 %v1108_v18  ;;  %627 = vadd.xlane.f32.xlu1 %v1113_v19 }
 0x20f   :  { %629 = vadd.xlane.f32.xlu0 %v1120_v20  ;;  %631 = vadd.xlane.f32.xlu1 %v1125_v21 }
 0x211   :  { %v526_v0 = vpop.xlane.xlu1 %525 }
 0x212   :  { %v685_v37 = vmul.f32 0.95, %v526_v0 }
 0x213   :  { %633 = vadd.xlane.f32.xlu0 %v1132_v22  ;;  %635 = vadd.xlane.f32.xlu1 %v1137_v23 }
 0x215   :  { %v1575_v2 = vpop.xlane.xlu1 %531 }
 0x216   :  { %v688_v35 = vmul.f32 0.95, %v1575_v2 }
 0x217   :  { %637 = vadd.xlane.f32.xlu0 %v1144_v24  ;;  %639 = vadd.xlane.f32.xlu1 %v1149_v25 }
 0x219   :  { %v1579_v5 = vpop.xlane.xlu1 %535 }
 0x21a   :  { %v690_v2 = vmul.f32 0.95, %v1579_v5 }
 0x21b   :  { %641 = vadd.xlane.f32.xlu0 %v1156_v26  ;;  %643 = vadd.xlane.f32.xlu1 %v1161_v27 }
 0x21f   :  { %645 = vadd.xlane.f32.xlu0 %v1168_v28  ;;  %647 = vadd.xlane.f32.xlu1 %v1173_v29  ;;  %v918_v28 = vpop.eup %917 }
 0x220   :  { %v920_v29 = vpop.eup %919  ;;  %v302_v61 = vmul.f32 0.6931472, %v918_v28 }
 0x221   :  { %v922_v47 = vpop.eup %921  ;;  %v300_v62 = vmul.f32 0.6931472, %v920_v29 }
 0x222   :  { %v924_v50 = vpop.eup %923  ;;  %v304_v55 = vmul.f32 0.6931472, %v922_v47  ;;  %v654_v48 = vadd.f32 %v302_v61, %v1197_v39 }
 0x223   :  { %649 = vadd.xlane.f32.xlu0 %v1180_v30  ;;  %651 = vadd.xlane.f32.xlu1 %v1185_v31  ;;  %v926_v54 = vpop.eup %925  ;;  %v306_v57 = vmul.f32 0.6931472, %v924_v50  ;;  %v653_v43 = vadd.f32 %v300_v62, %v1189_v33 }
 0x224   :  { %v928_v52 = vpop.eup %927  ;;  %v718_v53 = vsub.f32 %v654_v48, %v686_v56  ;;  %v655_v36 = vadd.f32 %v304_v55, %v1191_v34  ;;  %v308_v39 = vmul.f32 0.6931472, %v926_v54  ;;  %v1931_v55 = vld [vmem:[#allocation3_spill] sm:$0xff] }
 0x225   :  { %v717_v58 = vsub.f32 %v653_v43, %v685_v37  ;;  %v310_v45 = vmul.f32 0.6931472, %v928_v52  ;;  %v930_v41 = vpop.eup %929  ;;  %v656_v33 = vadd.f32 %v306_v57, %v1199_v40  ;;  %v1932_v54 = vld [vmem:[#allocation31_spill] sm:$0xff]  ;;  %v1933_v57 = vld [vmem:[#allocation33_spill] sm:$0xff] }
 0x226   :  { %v932_v1 = vpop.eup %931  ;;  %v719_v34 = vsub.f32 %v655_v36, %v687_v46  ;;  %v312_v62 = vmul.f32 0.6931472, %v930_v41  ;;  %v657_v50 = vadd.f32 %v308_v39, %v1930_v4  ;;  %947 = vlog2.f32 %v1932_v54 }
 0x227   :  { %v720_v47 = vsub.f32 %v656_v33, %v688_v35  ;;  %v934_v61 = vpop.eup %933  ;;  %v658_v5 = vadd.f32 %v310_v45, %v1931_v55  ;;  %v314_v37 = vmul.f32 0.6931472, %v932_v1  ;;  %949 = vlog2.f32 %v1933_v57 }
 0x228   :  { %v936_v56 = vpop.eup %935  ;;  %v721_v43 = vsub.f32 %v657_v50, %v689_v3  ;;  %v316_v35 = vmul.f32 0.6931472, %v934_v61  ;;  %v1939_v50 = vld [vmem:[#allocation6_spill] sm:$0xff] }
 0x229   :  { %v938_v45 = vpop.eup %937 }
 0x22a   :  { %v322_v61 = vmul.f32 0.6931472, %v938_v45  ;;  %v661_v55 = vadd.f32 %v316_v35, %v1939_v50  ;;  %v1943_v35 = vld [vmem:[#allocation9_spill] sm:$0xff] }
 0x238   :  { %v1581_v6 = vpop.xlane.xlu0 %537 }
 0x23c   :  { %v1583_v7 = vpop.xlane.xlu1 %539 }
 0x23d   :  { %v692_v60 = vmul.f32 0.95, %v1583_v7  ;;  %v1936_v7 = vld [vmem:[#allocation5_spill] sm:$0xff] }
 0x23e   :  { %v660_v41 = vadd.f32 %v314_v37, %v1936_v7 }
 0x240   :  { %v1585_v8 = vpop.xlane.xlu1 %543  ;;  %v1587_v9 = vpop.xlane.xlu0 %541 }
 0x244   :  { %v1589_v10 = vpop.xlane.xlu1 %547  ;;  %v1591_v11 = vpop.xlane.xlu0 %545 }
 0x245   :  { %v696_v57 = vmul.f32 0.95, %v1589_v10  ;;  %v1942_v10 = vld [vmem:[#allocation34_spill] sm:$0xff] }
 0x248   :  { %v1593_v12 = vpop.xlane.xlu1 %551  ;;  %v1595_v13 = vpop.xlane.xlu0 %549 }
 0x24c   :  { %v1597_v14 = vpop.xlane.xlu1 %555  ;;  %v1599_v15 = vpop.xlane.xlu0 %553 }
 0x250   :  { %v1601_v16 = vpop.xlane.xlu1 %559  ;;  %v1603_v17 = vpop.xlane.xlu0 %557 }
 0x254   :  { %v1605_v18 = vpop.xlane.xlu1 %563  ;;  %v1607_v19 = vpop.xlane.xlu0 %561 }
 0x258   :  { %v1609_v20 = vpop.xlane.xlu1 %567  ;;  %v1611_v21 = vpop.xlane.xlu0 %565 }
 0x25c   :  { %v1616_v22 = vpop.xlane.xlu1 %571  ;;  %v1618_v23 = vpop.xlane.xlu0 %569 }
 0x260   :  { %v1621_v24 = vpop.xlane.xlu1 %575  ;;  %v1623_v25 = vpop.xlane.xlu0 %573 }
 0x264   :  { %v1627_v26 = vpop.xlane.xlu1 %579  ;;  %v1629_v27 = vpop.xlane.xlu0 %577 }
 0x268   :  { %v1633_v30 = vpop.xlane.xlu1 %583  ;;  %v1635_v31 = vpop.xlane.xlu0 %581 }
 0x26c   :  { %v1639_v44 = vpop.xlane.xlu1 %587  ;;  %v1641_v49 = vpop.xlane.xlu0 %585 }
 0x270   :  { %v592_v38 = vpop.xlane.xlu1 %591  ;;  %v590_v51 = vpop.xlane.xlu0 %589 }
 0x271   :  { %v750_v63 = vmul.f32 0.000390625, %v592_v38  ;;  %v749_v32 = vmul.f32 0.000390625, %v590_v51  ;;  %v722_v38 = vsub.f32 %v658_v5, %v690_v2  ;;  %v693_v2 = vmul.f32 0.95, %v1587_v9 }
 0x273   :  { %v782_v59 = vsub.f32 %v718_v53, %v750_v63  ;;  %v781_v0 = vsub.f32 %v717_v58, %v749_v32  ;;  %v691_v53 = vmul.f32 0.95, %v1581_v6  ;;  %v318_v63 = vmul.f32 0.6931472, %v936_v56  ;;  %v1934_v6 = vld [vmem:[#allocation30_spill] sm:$0xff]  ;;  %v1935_v32 = vld [vmem:[#allocation4_spill] sm:$0xff] }
 0x274   :  { %v596_v28 = vpop.xlane.xlu1 %595  ;;  %v594_v29 = vpop.xlane.xlu0 %593  ;;  %951 = vlog2.f32 %v1934_v6  ;;  %v659_v39 = vadd.f32 %v312_v62, %v1935_v32  ;;  %v1938_v62 = vld [vmem:[#allocation7_spill] sm:$0xff]  ;;  %v1940_v56 = vld [vmem:[#allocation36_spill] sm:$0xff] }
 0x275   :  { %815 = vst.msk [vmem:[%s1856_s2 + $0x8] sm:$0xff] %vm813_vm0, %v782_v59  ;;  %814 = vst.msk [vmem:[%s1856_s2] sm:$0xff] %vm813_vm0, %v781_v0  ;;  %v752_v40 = vmul.f32 0.000390625, %v596_v28  ;;  %v751_v42 = vmul.f32 0.000390625, %v594_v29  ;;  %v940_v0 = vpop.eup %939  ;;  %v662_v4 = vadd.f32 %v318_v63, %v1938_v62  ;;  %v664_v63 = vadd.f32 %v322_v61, %v1943_v35 }
 0x276   :  { %v723_v1 = vsub.f32 %v659_v39, %v691_v53  ;;  %v942_v29 = vpop.eup %941  ;;  %v320_v5 = vmul.f32 0.6931472, %v940_v0  ;;  %v1948_v62 = vld [vmem:[#allocation41_spill] sm:$0xff] }
 0x277   :  { %v784_v48 = vsub.f32 %v720_v47, %v752_v40  ;;  %v783_v52 = vsub.f32 %v719_v34, %v751_v42  ;;  %v694_v34 = vmul.f32 0.95, %v1585_v8  ;;  %v724_v47 = vsub.f32 %v660_v41, %v692_v60  ;;  %v1937_v8 = vld [vmem:[#allocation32_spill] sm:$0xff]  ;;  %v944_v9 = vpop.eup %943 }
 0x278   :  { %v600_v36 = vpop.xlane.xlu1 %599  ;;  %v598_v46 = vpop.xlane.xlu0 %597  ;;  %953 = vlog2.f32 %v1937_v8  ;;  %v728_v41 = vsub.f32 %v664_v63, %v696_v57  ;;  %v702_v63 = vmul.f32 0.95, %v1601_v16  ;;  %v1953_v16 = vld [vmem:[#allocation39_spill] sm:$0xff] }
 0x279   :  { %817 = vst.msk [vmem:[%s1856_s2 + $0x18] sm:$0xff] %vm813_vm0, %v784_v48  ;;  %816 = vst.msk [vmem:[%s1856_s2 + $0x10] sm:$0xff] %vm813_vm0, %v783_v52  ;;  %v754_v51 = vmul.f32 0.000390625, %v600_v36  ;;  %v753_v58 = vmul.f32 0.000390625, %v598_v46  ;;  %955 = vlog2.f32 %v1940_v56  ;;  %v726_v52 = vsub.f32 %v662_v4, %v694_v34  ;;  %v946_v6 = vpop.eup %945 }
 0x27a   :  { %v1941_v48 = vld [vmem:[#allocation38_spill] sm:$0xff]  ;;  %v725_v36 = vsub.f32 %v661_v55, %v693_v2  ;;  %v695_v46 = vmul.f32 0.95, %v1591_v11  ;;  %v1944_v11 = vld [vmem:[#allocation8_spill] sm:$0xff]  ;;  %v948_v7 = vpop.eup %947  ;;  %v1946_v2 = vld [vmem:[#allocation11_spill] sm:$0xff] }
 0x27b   :  { %v786_v33 = vsub.f32 %v722_v38, %v754_v51  ;;  %v785_v59 = vsub.f32 %v721_v43, %v753_v58  ;;  %957 = vlog2.f32 %v1941_v48  ;;  %v324_v51 = vmul.f32 0.6931472, %v942_v29 }
 0x27c   :  { %v604_v3 = vpop.xlane.xlu1 %603  ;;  %v602_v28 = vpop.xlane.xlu0 %601  ;;  %v326_v58 = vmul.f32 0.6931472, %v944_v9  ;;  %959 = vlog2.f32 %v1942_v10  ;;  %v663_v32 = vadd.f32 %v320_v5, %v1944_v11  ;;  %v328_v8 = vmul.f32 0.6931472, %v948_v7 }
 0x27d   :  { %819 = vst.msk [vmem:[%s1856_s2 + $0x28] sm:$0xff] %vm813_vm0, %v786_v33  ;;  %818 = vst.msk [vmem:[%s1856_s2 + $0x20] sm:$0xff] %vm813_vm0, %v785_v59  ;;  %v756_v40 = vmul.f32 0.000390625, %v604_v3  ;;  %v755_v42 = vmul.f32 0.000390625, %v602_v28 }
 0x27e   :  { %v698_v33 = vmul.f32 0.95, %v1593_v12  ;;  %v727_v34 = vsub.f32 %v663_v32, %v695_v46  ;;  %v697_v3 = vmul.f32 0.95, %v1595_v13  ;;  %v1945_v12 = vld [vmem:[#allocation35_spill] sm:$0xff] }
 0x27f   :  { %v788_v37 = vsub.f32 %v724_v47, %v756_v40  ;;  %v787_v54 = vsub.f32 %v723_v1, %v755_v42  ;;  %v950_v1 = vpop.eup %949  ;;  %v330_v47 = vmul.f32 0.6931472, %v946_v6  ;;  %961 = vlog2.f32 %v1945_v12  ;;  %v1947_v42 = vld [vmem:[#allocation10_spill] sm:$0xff]  ;;  %v1957_v12 = vld [vmem:[#allocation44_spill] sm:$0xff] }
 0x280   :  { %v608_v43 = vpop.xlane.xlu1 %607  ;;  %v606_v53 = vpop.xlane.xlu0 %605  ;;  %v666_v40 = vadd.f32 %v326_v58, %v1946_v2  ;;  %v665_v61 = vadd.f32 %v324_v51, %v1947_v42  ;;  %963 = vlog2.f32 %v1948_v62  ;;  %v700_v9 = vmul.f32 0.95, %v1597_v14  ;;  %v1949_v14 = vld [vmem:[#allocation37_spill] sm:$0xff] }
 0x281   :  { %821 = vst.msk [vmem:[%s1856_s2 + $0x38] sm:$0xff] %vm813_vm0, %v788_v37  ;;  %820 = vst.msk [vmem:[%s1856_s2 + $0x30] sm:$0xff] %vm813_vm0, %v787_v54  ;;  %v758_v38 = vmul.f32 0.000390625, %v608_v43  ;;  %v757_v60 = vmul.f32 0.000390625, %v606_v53  ;;  %v952_v13 = vpop.eup %951  ;;  %965 = vlog2.f32 %v1949_v14 }
 0x282   :  { %v730_v55 = vsub.f32 %v666_v40, %v698_v33  ;;  %v729_v37 = vsub.f32 %v665_v61, %v697_v3  ;;  %v699_v54 = vmul.f32 0.95, %v1599_v15  ;;  %v332_v57 = vmul.f32 0.6931472, %v950_v1  ;;  %v1950_v53 = vld [vmem:[#allocation13_spill] sm:$0xff]  ;;  %v1951_v15 = vld [vmem:[#allocation42_spill] sm:$0xff] }
 0x283   :  { %v790_v39 = vsub.f32 %v726_v52, %v758_v38  ;;  %v789_v45 = vsub.f32 %v725_v36, %v757_v60  ;;  %v334_v43 = vmul.f32 0.6931472, %v952_v13  ;;  %v668_v36 = vadd.f32 %v330_v47, %v1950_v53  ;;  %v1952_v38 = vld [vmem:[#allocation12_spill] sm:$0xff]  ;;  %v1955_v1 = vld [vmem:[#allocation14_spill] sm:$0xff] }
 0x284   :  { %v612_v59 = vpop.xlane.xlu1 %611  ;;  %v610_v0 = vpop.xlane.xlu0 %609  ;;  %967 = vlog2.f32 %v1951_v15  ;;  %v667_v60 = vadd.f32 %v328_v8, %v1952_v38  ;;  %v704_v40 = vmul.f32 0.95, %v1605_v18  ;;  %v703_v8 = vmul.f32 0.95, %v1607_v19  ;;  %v1958_v18 = vld [vmem:[#allocation40_spill] sm:$0xff] }
 0x285   :  { %823 = vst.msk [vmem:[%s1856_s2 + $0x48] sm:$0xff] %vm813_vm0, %v790_v39  ;;  %822 = vst.msk [vmem:[%s1856_s2 + $0x40] sm:$0xff] %vm813_vm0, %v789_v45  ;;  %v760_v28 = vmul.f32 0.000390625, %v612_v59  ;;  %v759_v29 = vmul.f32 0.000390625, %v610_v0  ;;  %v954_v46 = vpop.eup %953  ;;  %v732_v35 = vsub.f32 %v668_v36, %v700_v9  ;;  %969 = vlog2.f32 %v1953_v16 }
 0x286   :  { %v956_v10 = vpop.eup %955  ;;  %v731_v39 = vsub.f32 %v667_v60, %v699_v54  ;;  %v701_v45 = vmul.f32 0.95, %v1603_v17  ;;  %v338_v33 = vmul.f32 0.6931472, %v954_v46  ;;  %v1954_v59 = vld [vmem:[#allocation15_spill] sm:$0xff]  ;;  %v1959_v9 = vld [vmem:[#allocation17_spill] sm:$0xff] }
 0x287   :  { %v792_v4 = vsub.f32 %v728_v41, %v760_v28  ;;  %v791_v50 = vsub.f32 %v727_v34, %v759_v29  ;;  %v670_v0 = vadd.f32 %v334_v43, %v1954_v59  ;;  %v669_v34 = vadd.f32 %v332_v57, %v1955_v1  ;;  %v1956_v28 = vld [vmem:[#allocation43_spill] sm:$0xff]  ;;  %v1960_v19 = vld [vmem:[#allocation16_spill] sm:$0xff] }
 0x288   :  { %v616_v5 = vpop.xlane.xlu1 %615  ;;  %v614_v56 = vpop.xlane.xlu0 %613  ;;  %v336_v3 = vmul.f32 0.6931472, %v956_v10  ;;  %971 = vlog2.f32 %v1956_v28  ;;  %v706_v43 = vmul.f32 0.95, %v1609_v20  ;;  %v705_v46 = vmul.f32 0.95, %v1611_v21 }
 0x289   :  { %825 = vst.msk [vmem:[%s1856_s2 + $0x58] sm:$0xff] %vm813_vm0, %v792_v4  ;;  %824 = vst.msk [vmem:[%s1856_s2 + $0x50] sm:$0xff] %vm813_vm0, %v791_v50  ;;  %v762_v48 = vmul.f32 0.000390625, %v616_v5  ;;  %v761_v52 = vmul.f32 0.000390625, %v614_v56  ;;  %v958_v32 = vpop.eup %957  ;;  %973 = vlog2.f32 %v1957_v12  ;;  %v734_v2 = vsub.f32 %v670_v0, %v702_v63 }
 0x28a   :  { %v960_v17 = vpop.eup %959  ;;  %v733_v13 = vsub.f32 %v669_v34, %v701_v45  ;;  %v340_v50 = vmul.f32 0.6931472, %v958_v32  ;;  %975 = vlog2.f32 %v1958_v18  ;;  %v672_v5 = vadd.f32 %v338_v33, %v1959_v9  ;;  %v1962_v20 = vld [vmem:[#allocation19_spill] sm:$0xff]  ;;  %v1963_v10 = vld [vmem:[#allocation18_spill] sm:$0xff] }
 0x28b   :  { %v794_v51 = vsub.f32 %v730_v55, %v762_v48  ;;  %v793_v58 = vsub.f32 %v729_v37, %v761_v52  ;;  %v342_v55 = vmul.f32 0.6931472, %v960_v17  ;;  %v671_v37 = vadd.f32 %v336_v3, %v1960_v19  ;;  %v1965_v17 = vld [vmem:[#allocation21_spill] sm:$0xff]  ;;  %v1968_v19 = vld [vmem:[#allocation22_spill] sm:$0xff] }
 0x28c   :  { %v620_v6 = vpop.xlane.xlu1 %619  ;;  %v618_v11 = vpop.xlane.xlu0 %617  ;;  %v736_v57 = vsub.f32 %v672_v5, %v704_v40  ;;  %v707_v59 = vmul.f32 0.95, %v1618_v23 }
 0x28d   :  { %827 = vst.msk [vmem:[%s1856_s2 + $0x68] sm:$0xff] %vm813_vm0, %v794_v51  ;;  %826 = vst.msk [vmem:[%s1856_s2 + $0x60] sm:$0xff] %vm813_vm0, %v793_v58  ;;  %v764_v7 = vmul.f32 0.000390625, %v620_v6  ;;  %v763_v41 = vmul.f32 0.000390625, %v618_v11  ;;  %v962_v56 = vpop.eup %961  ;;  %v735_v36 = vsub.f32 %v671_v37, %v703_v8  ;;  %v674_v58 = vadd.f32 %v342_v55, %v1962_v20 }
 0x28e   :  { %v964_v52 = vpop.eup %963  ;;  %v346_v60 = vmul.f32 0.6931472, %v962_v56  ;;  %v1961_v51 = vld [vmem:[#allocation45_spill] sm:$0xff]  ;;  %v1964_v6 = vld [vmem:[#allocation46_spill] sm:$0xff]  ;;  %v1970_v20 = vld [vmem:[#allocation24_spill] sm:$0xff] }
 0x28f   :  { %v796_v29 = vsub.f32 %v732_v35, %v764_v7  ;;  %v795_v47 = vsub.f32 %v731_v39, %v763_v41  ;;  %977 = vlog2.f32 %v1961_v51  ;;  %v673_v35 = vadd.f32 %v340_v50, %v1963_v10  ;;  %v966_v21 = vpop.eup %965 }
 0x290   :  { %v624_v42 = vpop.xlane.xlu1 %623  ;;  %v622_v61 = vpop.xlane.xlu0 %621  ;;  %v344_v63 = vmul.f32 0.6931472, %v964_v52  ;;  %979 = vlog2.f32 %v1964_v6  ;;  %v738_v45 = vsub.f32 %v674_v58, %v706_v43  ;;  %v708_v7 = vmul.f32 0.95, %v1616_v22 }
 0x291   :  { %829 = vst.msk [vmem:[%s1856_s2 + $0x78] sm:$0xff] %vm813_vm0, %v796_v29  ;;  %828 = vst.msk [vmem:[%s1856_s2 + $0x70] sm:$0xff] %vm813_vm0, %v795_v47  ;;  %v766_v62 = vmul.f32 0.000390625, %v624_v42  ;;  %v765_v4 = vmul.f32 0.000390625, %v622_v61  ;;  %v968_v39 = vpop.eup %967  ;;  %v737_v16 = vsub.f32 %v673_v35, %v705_v46  ;;  %v676_v22 = vadd.f32 %v346_v60, %v1965_v17 }
 0x292   :  { %v350_v34 = vmul.f32 0.6931472, %v966_v21  ;;  %v970_v3 = vpop.eup %969  ;;  %v348_v28 = vmul.f32 0.6931472, %v968_v39  ;;  %v1966_v29 = vld [vmem:[#allocation20_spill] sm:$0xff] }
 0x293   :  { %v798_v54 = vsub.f32 %v734_v2, %v766_v62  ;;  %v797_v48 = vsub.f32 %v733_v13, %v765_v4  ;;  %v675_v47 = vadd.f32 %v344_v63, %v1966_v29  ;;  %v740_v40 = vsub.f32 %v676_v22, %v708_v7 }
 0x294   :  { %v628_v14 = vpop.xlane.xlu1 %627  ;;  %v626_v53 = vpop.xlane.xlu0 %625  ;;  %v710_v42 = vmul.f32 0.95, %v1621_v24  ;;  %v709_v4 = vmul.f32 0.95, %v1623_v25  ;;  %v354_v18 = vmul.f32 0.6931472, %v970_v3  ;;  %v677_v37 = vadd.f32 %v348_v28, %v1968_v19 }
 0x295   :  { %831 = vst.msk [vmem:[%s1856_s2 + $0x88] sm:$0xff] %vm813_vm0, %v798_v54  ;;  %830 = vst.msk [vmem:[%s1856_s2 + $0x80] sm:$0xff] %vm813_vm0, %v797_v48  ;;  %v768_v15 = vmul.f32 0.000390625, %v628_v14  ;;  %v767_v38 = vmul.f32 0.000390625, %v626_v53  ;;  %v972_v2 = vpop.eup %971  ;;  %v739_v62 = vsub.f32 %v675_v47, %v707_v59 }
 0x296   :  { %v974_v8 = vpop.eup %973  ;;  %v1967_v24 = vld [vmem:[#allocation23_spill] sm:$0xff]  ;;  %v352_v56 = vmul.f32 0.6931472, %v972_v2  ;;  %v712_v52 = vmul.f32 0.95, %v1627_v26  ;;  %v741_v14 = vsub.f32 %v677_v37, %v709_v4  ;;  %v1969_v26 = vld [vmem:[#allocation25_spill] sm:$0xff] }
 0x297   :  { %v800_v11 = vsub.f32 %v736_v57, %v768_v15  ;;  %v799_v32 = vsub.f32 %v735_v36, %v767_v38  ;;  %v678_v9 = vadd.f32 %v350_v34, %v1967_v24  ;;  %v976_v5 = vpop.eup %975  ;;  %v711_v53 = vmul.f32 0.95, %v1629_v27 }
 0x298   :  { %v632_v41 = vpop.xlane.xlu1 %631  ;;  %v630_v33 = vpop.xlane.xlu0 %629  ;;  %v356_v15 = vmul.f32 0.6931472, %v974_v8  ;;  %v358_v38 = vmul.f32 0.6931472, %v976_v5  ;;  %v680_v60 = vadd.f32 %v354_v18, %v1969_v26  ;;  %v679_v58 = vadd.f32 %v352_v56, %v1970_v20 }
 0x299   :  { %833 = vst.msk [vmem:[%s1856_s2 + $0x98] sm:$0xff] %vm813_vm0, %v800_v11  ;;  %832 = vst.msk [vmem:[%s1856_s2 + $0x90] sm:$0xff] %vm813_vm0, %v799_v32  ;;  %v770_v0 = vmul.f32 0.000390625, %v632_v41  ;;  %v769_v1 = vmul.f32 0.000390625, %v630_v33  ;;  %v742_v48 = vsub.f32 %v678_v9, %v710_v42 }
 0x29a   :  { %v744_v21 = vsub.f32 %v680_v60, %v712_v52  ;;  %v714_v63 = vmul.f32 0.95, %v1633_v30  ;;  %v743_v32 = vsub.f32 %v679_v58, %v711_v53  ;;  %v713_v39 = vmul.f32 0.95, %v1635_v31  ;;  %v1971_v41 = vld [vmem:[#allocation27_spill] sm:$0xff]  ;;  %v1972_v30 = vld [vmem:[#allocation26_spill] sm:$0xff] }
 0x29b   :  { %v802_v23 = vsub.f32 %v738_v45, %v770_v0  ;;  %v801_v12 = vsub.f32 %v737_v16, %v769_v1  ;;  %v682_v33 = vadd.f32 %v358_v38, %v1971_v41  ;;  %v681_v16 = vadd.f32 %v356_v15, %v1972_v30 }
 0x29c   :  { %v636_v61 = vpop.xlane.xlu1 %635  ;;  %v634_v13 = vpop.xlane.xlu0 %633  ;;  %v716_v17 = vmul.f32 0.95, %v1639_v44  ;;  %v715_v29 = vmul.f32 0.95, %v1641_v49  ;;  %v1974_v44 = vld [vmem:[#allocation28_spill] sm:$0xff] }
 0x29d   :  { %835 = vst.msk [vmem:[%s1856_s2 + $0xa8] sm:$0xff] %vm813_vm0, %v802_v23  ;;  %834 = vst.msk [vmem:[%s1856_s2 + $0xa0] sm:$0xff] %vm813_vm0, %v801_v12  ;;  %v772_v50 = vmul.f32 0.000390625, %v636_v61  ;;  %v771_v55 = vmul.f32 0.000390625, %v634_v13  ;;  %v978_v51 = vpop.eup %977  ;;  %v746_v34 = vsub.f32 %v682_v33, %v714_v63  ;;  %v745_v28 = vsub.f32 %v681_v16, %v713_v39 }
 0x29e   :  { %v980_v35 = vpop.eup %979  ;;  %v360_v59 = vmul.f32 0.6931472, %v978_v51  ;;  %v1973_v12 = vld [vmem:[#allocation29_spill] sm:$0xff] }
 0x29f   :  { %v804_v25 = vsub.f32 %v740_v40, %v772_v50  ;;  %v803_v54 = vsub.f32 %v739_v62, %v771_v55  ;;  %v362_v0 = vmul.f32 0.6931472, %v980_v35 }
 0x2a0   :  { %v640_v57 = vpop.xlane.xlu1 %639  ;;  %v638_v43 = vpop.xlane.xlu0 %637  ;;  %v683_v40 = vadd.f32 %v360_v59, %v1974_v44 }
 0x2a1   :  { %837 = vst.msk [vmem:[%s1856_s2 + $0xb8] sm:$0xff] %vm813_vm0, %v804_v25  ;;  %836 = vst.msk [vmem:[%s1856_s2 + $0xb0] sm:$0xff] %vm813_vm0, %v803_v54  ;;  %v774_v36 = vmul.f32 0.000390625, %v640_v57  ;;  %v773_v46 = vmul.f32 0.000390625, %v638_v43  ;;  %v684_v2 = vadd.f32 %v362_v0, %v1973_v12 }
 0x2a2   :  { %v747_v62 = vsub.f32 %v683_v40, %v715_v29 }
 0x2a3   :  { %v806_v27 = vsub.f32 %v742_v48, %v774_v36  ;;  %v805_v10 = vsub.f32 %v741_v14, %v773_v46  ;;  %v748_v8 = vsub.f32 %v684_v2, %v716_v17 }
 0x2a4   :  { %v644_v6 = vpop.xlane.xlu1 %643  ;;  %v642_v11 = vpop.xlane.xlu0 %641 }
 0x2a5   :  { %839 = vst.msk [vmem:[%s1856_s2 + $0xc8] sm:$0xff] %vm813_vm0, %v806_v27  ;;  %838 = vst.msk [vmem:[%s1856_s2 + $0xc0] sm:$0xff] %vm813_vm0, %v805_v10  ;;  %v776_v45 = vmul.f32 0.000390625, %v644_v6  ;;  %v775_v7 = vmul.f32 0.000390625, %v642_v11 }
 0x2a7   :  { %v808_v1 = vsub.f32 %v744_v21, %v776_v45  ;;  %v807_v31 = vsub.f32 %v743_v32, %v775_v7 }
 0x2a8   :  { %v648_v22 = vpop.xlane.xlu1 %647  ;;  %v646_v3 = vpop.xlane.xlu0 %645 }
 0x2a9   :  { %841 = vst.msk [vmem:[%s1856_s2 + $0xd8] sm:$0xff] %vm813_vm0, %v808_v1  ;;  %840 = vst.msk [vmem:[%s1856_s2 + $0xd0] sm:$0xff] %vm813_vm0, %v807_v31  ;;  %v778_v47 = vmul.f32 0.000390625, %v648_v22  ;;  %v777_v23 = vmul.f32 0.000390625, %v646_v3 }
 0x2ab   :  { %v810_v42 = vsub.f32 %v746_v34, %v778_v47  ;;  %v809_v61 = vsub.f32 %v745_v28, %v777_v23 }
 0x2ac   :  { %v652_v13 = vpop.xlane.xlu1 %651  ;;  %v650_v49 = vpop.xlane.xlu0 %649 }
 0x2ad   :  { %843 = vst.msk [vmem:[%s1856_s2 + $0xe8] sm:$0xff] %vm813_vm0, %v810_v42  ;;  %842 = vst.msk [vmem:[%s1856_s2 + $0xe0] sm:$0xff] %vm813_vm0, %v809_v61  ;;  %v780_v4 = vmul.f32 0.000390625, %v652_v13  ;;  %v779_v50 = vmul.f32 0.000390625, %v650_v49 }
 0x2af   :  { %v812_v55 = vsub.f32 %v748_v8, %v780_v4  ;;  %v811_v18 = vsub.f32 %v747_v62, %v779_v50 }
 0x2b1   :  { %845 = vst.msk [vmem:[%s1856_s2 + $0xf8] sm:$0xff] %vm813_vm0, %v812_v55  ;;  %844 = vst.msk [vmem:[%s1856_s2 + $0xf0] sm:$0xff] %vm813_vm0, %v811_v18 }

</bundles_post_ra>
